<compile_context>
chip_gen: v6e
topology: v6e:2x2x1
jax: 0.10.0
libtpu: 0.0.40
codegen_flags: <defaults>
</compile_context>

<pallas_src>
import functools

import jax
import jax.numpy as jnp
from jax.experimental import pallas as pl
from jax.experimental.pallas import tpu as pltpu


def _focal_loss_kernel(*refs, n_total, tiles_per_split, block_rows, gamma,
                       has_alpha):
    if has_alpha:
        logits_ref, target_ref, alpha_ref, out_ref, acc_ref = refs
    else:
        logits_ref, target_ref, out_ref, acc_ref = refs
        alpha_ref = None

    split = pl.program_id(0)
    step = pl.program_id(1)
    n_steps = pl.num_programs(1)

    @pl.when(step == 0)
    def _():
        acc_ref[...] = jnp.zeros_like(acc_ref)

    logits = logits_ref[...].astype(jnp.float32)           # (TN, C)
    tgt = target_ref[...]                                   # (TN, 1) int32
    tn, ncls = logits.shape

    # Row-validity mask: handles the ragged last tile and the clamped
    # duplicate tile the last split may see.  A select (not a multiply) keeps
    # NaN/Inf from padded garbage out of the sum.
    tile_idx = split * tiles_per_split + step
    row_ids = tile_idx * block_rows + jax.lax.broadcasted_iota(
        jnp.int32, (tn, 1), 0)
    valid = row_ids < n_total                                # (TN, 1) bool

    # Numerically stable softmax stats; log_probs is never materialized:
    #   logp_t = shifted_t - lse
    m = jnp.max(logits, axis=-1, keepdims=True)              # (TN, 1)
    shifted = logits - m                                      # (TN, C)
    lse = jnp.log(jnp.sum(jnp.exp(shifted), axis=-1, keepdims=True))  # (TN, 1)

    col = jax.lax.broadcasted_iota(jnp.int32, (tn, ncls), 1)
    onehot = (col == tgt).astype(jnp.float32)                 # (TN, C)

    if has_alpha:
        alpha = alpha_ref[...].astype(jnp.float32)            # (1, C)
        wa = onehot * alpha                                    # alpha_t one-hot
        w_t = jnp.sum(wa, axis=-1, keepdims=True)              # alpha[target]
        wst = jnp.sum(wa * shifted, axis=-1, keepdims=True)    # alpha_t*shift_t
        ce = w_t * lse - wst        # = -alpha_t * (shifted_t - lse)
    else:
        shifted_t = jnp.sum(onehot * shifted, axis=-1, keepdims=True)
        ce = lse - shifted_t        # = -log_softmax(logits)[target]

    pt = jnp.exp(-ce)
    one_minus_pt = 1.0 - pt
    g = float(gamma)
    if g == int(g) and 0 <= int(g) <= 8:
        # Integer gamma (default 2) -> chain of VPU multiplies, no EUP pow.
        mod = jnp.ones_like(one_minus_pt)
        for _ in range(int(g)):
            mod = mod * one_minus_pt
    else:
        mod = jnp.power(one_minus_pt, g)

    focal = jnp.where(valid, mod * ce, 0.0)                    # (TN, 1)
    acc_ref[...] = acc_ref[...] + jnp.sum(focal)               # bcast scalar add

    @pl.when(step == n_steps - 1)
    def _():
        out_ref[...] = acc_ref[...]


def focal_loss(logits, targets, gamma=2.0, alpha=None, block_rows=512):
    """Pallas focal loss. logits: (N, C) float (f32 or bf16), targets: (N,) ids."""
    n, c = logits.shape
    itemsize = jnp.dtype(logits.dtype).itemsize

    # Largest batch tile that keeps the double-buffered logits DMA comfortably
    # inside the v5e 16 MiB scoped-VMEM default (and v7x's 64 MiB physical).
    max_tile_bytes = 4 * 1024 * 1024
    rows_cap = max(16, max_tile_bytes // max(1, c * itemsize))
    tn = min(int(block_rows), int(rows_cap), n)
    if tn < n:
        tn = max(16, (tn // 16) * 16)   # sublane aligned (bf16-pack friendly)

    n_blocks = int(pl.cdiv(n, tn))
    num_splits = 2 if n_blocks >= 2 else 1      # engage both TCs on v7x
    tiles_per_split = int(pl.cdiv(n_blocks, num_splits))

    targets_2d = targets.astype(jnp.int32).reshape(n, 1)

    def tile_map(split, step):
        # Clamp so a split's extra (odd-n_blocks) tile never issues an
        # out-of-bounds DMA; its rows are masked inside the kernel.
        return (jnp.minimum(split * tiles_per_split + step, n_blocks - 1), 0)

    in_arrays = [logits, targets_2d]
    in_specs = [
        pl.BlockSpec((tn, c), tile_map),
        pl.BlockSpec((tn, 1), tile_map),
    ]
    has_alpha = alpha is not None
    if has_alpha:
        alpha_vec = jnp.asarray(alpha, jnp.float32).reshape(1, c)
        in_arrays.append(alpha_vec)
        in_specs.append(pl.BlockSpec((1, c), lambda split, step: (0, 0)))

    est_bytes = 2 * (tn * c * itemsize + tn * 4) + c * 4 + 4 * 8 * 128 * 4
    vmem_limit = int(min(max(3 * est_bytes, 8 << 20), 32 << 20))

    kernel = functools.partial(
        _focal_loss_kernel,
        n_total=n, tiles_per_split=tiles_per_split, block_rows=tn,
        gamma=float(gamma), has_alpha=has_alpha)

    partials = pl.pallas_call(
        kernel,
        out_shape=jax.ShapeDtypeStruct((8 * num_splits, 128), jnp.float32),
        grid=(num_splits, tiles_per_split),
        in_specs=in_specs,
        out_specs=pl.BlockSpec((8, 128), lambda split, step: (split, 0)),
        scratch_shapes=[pltpu.VMEM((8, 128), jnp.float32)],
        compiler_params=pltpu.CompilerParams(
            dimension_semantics=("parallel", "arbitrary"),
            vmem_limit_bytes=vmem_limit),
    )(*in_arrays)

    # Each split's (8,128) block holds its partial sum broadcast everywhere;
    # take one representative element per split, sum, and form the batch mean.
    return jnp.sum(partials[::8, 0]) / jnp.float32(n)


def _focal_loss_ref(logits, targets, gamma=2.0, alpha=None):
    """Pure-JAX reference mirroring the PyTorch module."""
    logits = logits.astype(jnp.float32)
    log_probs = jax.nn.log_softmax(logits, axis=-1)
    logp_t = jnp.take_along_axis(log_probs, targets[:, None], axis=-1)[:, 0]
    if alpha is None:
        w_t = 1.0
    else:
        w_t = jnp.asarray(alpha, jnp.float32)[targets]
    ce = -w_t * logp_t
    pt = jnp.exp(-ce)
    return jnp.mean((1.0 - pt) ** gamma * ce)


if __name__ == "__main__":
    key = jax.random.PRNGKey(0)
    k1, k2, k3, k4 = jax.random.split(key, 4)

    # Case 1: module defaults (gamma=2, alpha=None), f32, single-block path.
    n1, c1 = 8, 32
    logits1 = jax.random.normal(k1, (n1, c1), dtype=jnp.float32)
    targets1 = jax.random.randint(k2, (n1,), 0, c1, dtype=jnp.int32)
    loss1 = jax.block_until_ready(focal_loss(logits1, targets1, gamma=2.0))
    ref1 = _focal_loss_ref(logits1, targets1, gamma=2.0)
    assert jnp.allclose(loss1, ref1, atol=1e-5, rtol=1e-5), (loss1, ref1)

    # Case 2: bf16 logits, per-class alpha, tiled batch with a ragged last
    # tile and a 2-way split (exercises masking + clamped duplicate tile).
    n2, c2 = 40, 32
    logits2 = jax.random.normal(k3, (n2, c2), dtype=jnp.float32).astype(jnp.bfloat16)
    targets2 = jax.random.randint(k4, (n2,), 0, c2, dtype=jnp.int32)
    alpha2 = jnp.linspace(0.5, 1.5, c2, dtype=jnp.float32)
    loss2 = jax.block_until_ready(
        focal_loss(logits2, targets2, gamma=2.0, alpha=alpha2, block_rows=16))
    ref2 = _focal_loss_ref(logits2.astype(jnp.float32), targets2,
                           gamma=2.0, alpha=alpha2)
    assert jnp.allclose(loss2, ref2, atol=1e-4, rtol=1e-4), (loss2, ref2)

    print("KERNEL_OK")
</pallas_src>

<mosaic_0001>
module attributes {stable_mosaic.version = 11 : i64} {
  func.func @_focal_loss_kernel(%arg0: i32, %arg1: i32, %arg2: memref<8x32xf32, #tpu.memory_space<vmem>>, %arg3: memref<8x1xi32, #tpu.memory_space<vmem>>, %arg4: memref<8x128xf32, #tpu.memory_space<vmem>>, %arg5: memref<8x128xf32, #tpu.memory_space<vmem>>) attributes {dimension_semantics = [#tpu.dimension_semantics<parallel>, #tpu.dimension_semantics<arbitrary>], iteration_bounds = array<i64: 1, 1>, scalar_prefetch = 0 : i64, scratch_operands = 1 : i64, tpu.core_type = #tpu.core_type<tc>, window_params = [{transform_indices = @transform_0, window_bounds = array<i64: 8, 32>}, {transform_indices = @transform_1, window_bounds = array<i64: 8, 1>}, {transform_indices = @transform_2, window_bounds = array<i64: 8, 128>}]} {
    %c0_i32 = arith.constant 0 : i32
    %0 = arith.cmpi eq, %arg1, %c0_i32 : i32
    %1 = arith.extui %0 : i1 to i32
    %c0_i32_0 = arith.constant 0 : i32
    %2 = arith.cmpi ne, %1, %c0_i32_0 : i32
    scf.if %2 {
      %cst_18 = arith.constant 0.000000e+00 : f32
      %52 = vector.broadcast %cst_18 : f32 to vector<8x128xf32>
      %c0_19 = arith.constant 0 : index
      %c0_20 = arith.constant 0 : index
      %53 = vector.load %arg5[%c0_19, %c0_20] : memref<8x128xf32, #tpu.memory_space<vmem>>, vector<8x128xf32>
      tpu.vector_store %arg5[%c0_19, %c0_20], %52 {strides = array<i32>} : memref<8x128xf32, #tpu.memory_space<vmem>>, vector<8x128xf32>,
    } else {
    }
    %c0 = arith.constant 0 : index
    %c0_1 = arith.constant 0 : index
    %3 = vector.load %arg2[%c0, %c0_1] : memref<8x32xf32, #tpu.memory_space<vmem>>, vector<8x32xf32>
    %c0_2 = arith.constant 0 : index
    %c0_3 = arith.constant 0 : index
    %4 = vector.load %arg3[%c0_2, %c0_3] : memref<8x1xi32, #tpu.memory_space<vmem>>, vector<8x1xi32>
    %c1_i32 = arith.constant 1 : i32
    %5 = arith.muli %arg0, %c1_i32 : i32
    %6 = arith.addi %5, %arg1 : i32
    %c8_i32 = arith.constant 8 : i32
    %7 = arith.muli %6, %c8_i32 : i32
    %8 = tpu.iota {dimensions = array<i32: 0>} : vector<8x1xi32>
    %9 = vector.broadcast %7 : i32 to vector<8x1xi32>
    %10 = arith.addi %9, %8 : vector<8x1xi32>
    %c8_i32_4 = arith.constant 8 : i32
    %11 = vector.broadcast %c8_i32_4 : i32 to vector<8x1xi32>
    %12 = arith.cmpi slt, %10, %11 : vector<8x1xi32>
    %cst = arith.constant dense<0xFF800000> : vector<8xf32>
    %13 = vector.multi_reduction <maximumf>, %3, %cst [1] : vector<8x32xf32> to vector<8xf32>
    %14 = vector.shape_cast %13 : vector<8xf32> to vector<8x1xf32>
    %15 = vector.broadcast %14 : vector<8x1xf32> to vector<8x32xf32>
    %16 = arith.subf %3, %15 : vector<8x32xf32>
    %17 = math.exp %16 : vector<8x32xf32>
    %cst_5 = arith.constant dense<0.000000e+00> : vector<8xf32>
    %18 = vector.multi_reduction <add>, %17, %cst_5 [1] : vector<8x32xf32> to vector<8xf32>
    %19 = vector.shape_cast %18 : vector<8xf32> to vector<8x1xf32>
    %20 = math.log %19 : vector<8x1xf32>
    %21 = tpu.iota {dimensions = array<i32: 1>} : vector<8x32xi32>
    %22 = vector.broadcast %4 : vector<8x1xi32> to vector<8x32xi32>
    %23 = arith.cmpi eq, %21, %22 : vector<8x32xi32>
    %24 = arith.extui %23 : vector<8x32xi1> to vector<8x32xi32>
    %25 = arith.sitofp %24 : vector<8x32xi32> to vector<8x32xf32>
    %26 = arith.mulf %25, %16 : vector<8x32xf32>
    %cst_6 = arith.constant dense<0.000000e+00> : vector<8xf32>
    %27 = vector.multi_reduction <add>, %26, %cst_6 [1] : vector<8x32xf32> to vector<8xf32>
    %28 = vector.shape_cast %27 : vector<8xf32> to vector<8x1xf32>
    %29 = arith.subf %20, %28 : vector<8x1xf32>
    %cst_7 = arith.constant 0.000000e+00 : f32
    %30 = vector.broadcast %cst_7 : f32 to vector<8x1xf32>
    %31 = arith.subf %30, %29 : vector<8x1xf32>
    %32 = math.exp %31 : vector<8x1xf32>
    %cst_8 = arith.constant 1.000000e+00 : f32
    %33 = vector.broadcast %cst_8 : f32 to vector<8x1xf32>
    %34 = arith.subf %33, %32 : vector<8x1xf32>
    %cst_9 = arith.constant 1.000000e+00 : f32
    %35 = vector.broadcast %cst_9 : f32 to vector<8x1xf32>
    %36 = arith.mulf %35, %34 : vector<8x1xf32>
    %37 = arith.mulf %36, %34 : vector<8x1xf32>
    %38 = arith.mulf %37, %29 : vector<8x1xf32>
    %cst_10 = arith.constant 0.000000e+00 : f32
    %39 = vector.broadcast %cst_10 : f32 to vector<8x1xf32>
    %40 = arith.select %12, %38, %39 : vector<8x1xi1>, vector<8x1xf32>
    %c0_11 = arith.constant 0 : index
    %c0_12 = arith.constant 0 : index
    %41 = vector.load %arg5[%c0_11, %c0_12] : memref<8x128xf32, #tpu.memory_space<vmem>>, vector<8x128xf32>
    %42 = vector.shape_cast %40 : vector<8x1xf32> to vector<1x8x1xf32>
    %cst_13 = arith.constant dense<0.000000e+00> : vector<1xf32>
    %43 = vector.multi_reduction <add>, %42, %cst_13 [1, 2] : vector<1x8x1xf32> to vector<1xf32>
    %44 = vector.shape_cast %43 : vector<1xf32> to vector<1x1x1xf32>
    %45 = vector.extract %44[0, 0, 0] : f32 from vector<1x1x1xf32>
    %46 = vector.broadcast %45 : f32 to vector<8x128xf32>
    %47 = arith.addf %41, %46 : vector<8x128xf32>
    %c0_14 = arith.constant 0 : index
    %c0_15 = arith.constant 0 : index
    %48 = vector.load %arg5[%c0_14, %c0_15] : memref<8x128xf32, #tpu.memory_space<vmem>>, vector<8x128xf32>
    tpu.vector_store %arg5[%c0_14, %c0_15], %47 {strides = array<i32>} : memref<8x128xf32, #tpu.memory_space<vmem>>, vector<8x128xf32>,
    %c0_i32_16 = arith.constant 0 : i32
    %49 = arith.cmpi eq, %arg1, %c0_i32_16 : i32
    %50 = arith.extui %49 : i1 to i32
    %c0_i32_17 = arith.constant 0 : i32
    %51 = arith.cmpi ne, %50, %c0_i32_17 : i32
    scf.if %51 {
      %c0_18 = arith.constant 0 : index
      %c0_19 = arith.constant 0 : index
      %52 = vector.load %arg5[%c0_18, %c0_19] : memref<8x128xf32, #tpu.memory_space<vmem>>, vector<8x128xf32>
      %c0_20 = arith.constant 0 : index
      %c0_21 = arith.constant 0 : index
      %53 = vector.load %arg4[%c0_20, %c0_21] : memref<8x128xf32, #tpu.memory_space<vmem>>, vector<8x128xf32>
      tpu.vector_store %arg4[%c0_20, %c0_21], %52 {strides = array<i32>} : memref<8x128xf32, #tpu.memory_space<vmem>>, vector<8x128xf32>,
    } else {
    }
    return
  }
  func.func @transform_0(%arg0: i32, %arg1: i32) -> (i32, i32) {
    %c1_i32 = arith.constant 1 : i32
    %0 = arith.muli %arg0, %c1_i32 : i32
    %1 = arith.addi %0, %arg1 : i32
    %c0_i32 = arith.constant 0 : i32
    %2 = arith.minsi %1, %c0_i32 : i32
    %c0_i32_0 = arith.constant 0 : i32
    %c0_i32_1 = arith.constant 0 : i32
    return %2, %c0_i32_0 : i32, i32
  }
  func.func @transform_1(%arg0: i32, %arg1: i32) -> (i32, i32) {
    %c1_i32 = arith.constant 1 : i32
    %0 = arith.muli %arg0, %c1_i32 : i32
    %1 = arith.addi %0, %arg1 : i32
    %c0_i32 = arith.constant 0 : i32
    %2 = arith.minsi %1, %c0_i32 : i32
    %c0_i32_0 = arith.constant 0 : i32
    %c0_i32_1 = arith.constant 0 : i32
    return %2, %c0_i32_0 : i32, i32
  }
  func.func @transform_2(%arg0: i32, %arg1: i32) -> (i32, i32) {
    %c0_i32 = arith.constant 0 : i32
    %c0_i32_0 = arith.constant 0 : i32
    return %arg0, %c0_i32 : i32, i32
  }
}

</mosaic_0001>

<bundles_post_ra>
// kernel: tpu_custom_call.1
= control target key start
LH: loop header
LB: loop body
LE: loop exit
PB: predicated region body
PF: predicated region fallthrough
CT: control target
= control target key end

     0   :  { %vm80_vm0 = vcmask 261120   ;;  %s223_s0 = inlined_call_operand.vmem [shape: f32[8,32], index: 0, kind: input, shape index: {}]   ;;  %s224_s1 = inlined_call_operand.vmem [shape: s32[8,1], index: 1, kind: input, shape index: {}]   ;;  %s225_s2 = inlined_call_operand.hbm [shape: f32[8,128], index: 2, kind: output, shape index: {}]  }
   0x1   :  { %v71_v0 = vld [vmem:[%s223_s0] sm:$0xff] }
   0x2   :  { %7 = vsyncpa [#allocation4], 0  ;;  %v81_v1 = vsel %vm80_vm0, %v71_v0, -inf  ;;  %v193_v2 = vmov 0   ;;  %v72_v3 = vld [vmem:[%s224_s1] sm:$0xff]  ;;  %v92_v7 = vlaneseq  ;;  %v194_v10 = vmov 0.0  }
   0x3   :  { %164 = vset.pattern.permute.xlu0 %v193_v2  ;;  %vm113_vm2 = vcmask 7168   ;;  %s195_s0 = smov [#allocation3]  }
   0x4   :  { %82 = vmax.xlane.f32.xlu0 %v81_v1  ;;  %v93_v8 = vand.u32 127, %v92_v7  ;;  %s138_s1 = sshll.u32 %s195_s0, 4  ;;  %s139_s1 = int_to_ptr.vmem [resolvable:$true] %s138_s1 }
   0x5   :  { %s171_s14 = scalar_lea.vmem %s139_s1, 128  ;;  %p176_p1 = scmp.lt.s32.totalorder %s139_s1, %s139_s1 }
   0x6   :  { %p172_p0 = scmp.ne.s32.totalorder %s139_s1, %s171_s14  ;;  %p177_p2 = scmp.lt.s32.totalorder %s171_s14, %s171_s14 }
   0x8   :  { %p178_p3 = por %p177_p2, %p176_p1 }
   0xa   :  { %p179_p4 = pnand %p178_p3, %p172_p0 }
  0x1a   :  { %95 = vperm.xlu0 %164, %v72_v3  }
  0x8d   :  { %v83_v4 = vpop.xlane.xlu0 %82 }
  0x8e   :  { %v84_v5 = vsub.f32 %v71_v0, %v83_v4 }
  0x90   :  { %v85_v6 = vmul.f32 1.442695, %v84_v5 }
  0x92   :  { %165 = vpow2.f32 %v85_v6 }
  0x95   :  { %v96_v9 = vpop.permute.xlu0 %95 }
  0x96   :  { %vm97_vm1 = vcmp.eq.s32.totalorder %v93_v8, %v96_v9 }
  0x97   :  { %v158_v11 = vsel %vm97_vm1, 1.0, %v194_v10 }
  0x98   :  { %v100_v14 = vmul.f32 %v158_v11, %v84_v5 }
  0x9a   :  { %v101_v15 = vsel %vm80_vm0, %v100_v14, 0.0 }
  0x9f   :  { %v166_v12 = vpop.eup %165 }
  0xa0   :  { %v87_v13 = vsel %vm80_vm0, %v166_v12, 0.0 }
  0xa1   :  { %88 = vadd.xlane.f32.xlu1 %v87_v13 }
  0xa5   :  { %102 = vadd.xlane.f32.xlu1 %v101_v15 }
 0x12a   :  { %v89_v16 = vpop.xlane.xlu1 %88 }
 0x12b   :  { %167 = vlog2.f32 %v89_v16 }
 0x12e   :  { %v103_v19 = vpop.xlane.xlu1 %102 }
 0x138   :  { %v168_v17 = vpop.eup %167 }
 0x139   :  { %v91_v18 = vmul.f32 0.6931472, %v168_v17 }
 0x13b   :  { %v104_v20 = vsub.f32 %v91_v18, %v103_v19 }
 0x13d   :  { %v105_v21 = vsub.f32 0.0, %v104_v20 }
 0x13f   :  { %v106_v22 = vmul.f32 1.442695, %v105_v21 }
 0x141   :  { %169 = vpow2.f32 %v106_v22 }
 0x14e   :  { %v170_v23 = vpop.eup %169 }
 0x14f   :  { %v108_v24 = vsub.f32 1.0, %v170_v23 }
 0x151   :  { %v109_v25 = vmul.f32 %v108_v24, %v108_v24 }
 0x153   :  { %v110_v26 = vmul.f32 %v109_v25, %v104_v20 }
 0x155   :  { %v114_v27 = vsel %vm113_vm2, %v110_v26, 0.0 }
 0x156   :  { %115 = vadd.xlane.f32.xlu1 %v114_v27 }
 0x1df   :  { %v116_v28 = vpop.xlane.xlu1 %115 }
 0x1e0   :  { %v117_v29 = vrot.slane %v116_v28, 4 }
 0x1e2   :  { %v118_v30 = vadd.f32 %v117_v29, %v116_v28 }
 0x1e4   :  { %v119_v31 = vrot.slane %v118_v30, 2 }
 0x1e6   :  { %v120_v32 = vadd.f32 %v119_v31, %v118_v30 }
 0x1e8   :  { %v121_v33 = vrot.slane %v120_v32, 1 }
 0x1ea   :  { %v122_v34 = vadd.f32 %v121_v33, %v120_v32 }
 0x1ec   :  { %159 = vpush %v122_v34 }
 0x21d   :  { %s160_s13 = spop %159 }
 0x21e   :  { %v124_v35 = vstv %s160_s13 }
 0x21f   :  { %131 = vst [vmem:[#allocation3] sm:$0xff] %v124_v35 }
 0x220   :  { %182 = shalt.err (!%p179_p4)
}
 0x221   :  { %141 = dma.vmem_to_hbm [thread:$0]  %s139_s1, 128, %s225_s2, [#allocation4]  }
 0x222   :  { %191 = dma.done.wait [#allocation4], 128  }
 0x223   :  { %192 = vsyncadd [#allocation4], 4294967168 }
 0x224   :  { %145 = vsyncpa [#allocation4], 1 }

</bundles_post_ra>
